<compile_context>
chip_gen: v7x
topology: tpu7x:2x2x1
jax: 0.10.0
libtpu: 0.0.40
codegen_flags: <defaults>
</compile_context>

<pallas_src>
import functools

import jax
import jax.numpy as jnp
from jax.experimental import pallas as pl
from jax.experimental.pallas import tpu as pltpu


def _round_up(x, m):
    return ((x + m - 1) // m) * m


def _head_matmul_kernel(x_ref, w_ref, b_ref, o_ref):
    # x_ref: (C, t_hw)    activation tile, channels on sublanes, pixels on lanes
    # w_ref: (Cout, C)    fused [box|cls|dir] 1x1-conv weights (pre-transposed)
    # b_ref: (Cout, 1)    fused biases
    # o_ref: (Cout, t_hw) lane-dense output tile
    acc = jnp.dot(w_ref[...], x_ref[...], preferred_element_type=jnp.float32)
    o_ref[...] = (acc + b_ref[...]).astype(o_ref.dtype)


@functools.partial(jax.jit, static_argnames=("splits", "t_hw"))
def ssd_rotate_head_forward(x_nchw, w_cat, b_cat, splits, *, t_hw=1024):
    """Fused 1x1-conv head (conv_box + conv_cls + conv_dir_cls).

    Args:
      x_nchw: (N, C, H, W) input features (PyTorch NCHW convention).
      w_cat:  (C, Cout_total) concatenated 1x1-conv weights, Cout order
              [box | cls | dir].
      b_cat:  (Cout_total,) concatenated biases.
      splits: (num_box, num_cls, num_dir) output-channel split sizes.
      t_hw:   spatial tile width (rounded to a multiple of 128; clamped to the
              feature map).
    Returns:
      (box_preds, cls_preds, dir_cls_preds), each (N, H, W, c) -- identical
      semantics to the PyTorch module's permute(0, 2, 3, 1).contiguous().
    """
    N, C, H, W = x_nchw.shape
    Cout = w_cat.shape[1]
    HW = H * W

    # Spatial tile: multiple of 128 (lane width), no larger than padded H*W.
    t_hw = max(128, min(_round_up(t_hw, 128), _round_up(HW, 128)))

    x3 = x_nchw.reshape(N, C, HW)          # layout-free reshape of NCHW
    w_t = jnp.transpose(w_cat)             # (Cout, C) -- tiny
    b2d = b_cat.reshape(Cout, 1)

    grid = (N, pl.cdiv(HW, t_hw))          # ragged HW handled by Pallas masking

    itemsize = jnp.dtype(x_nchw.dtype).itemsize
    cost = pl.CostEstimate(
        flops=2 * N * HW * C * Cout,
        transcendentals=0,
        bytes_accessed=(N * C * HW + Cout * C + Cout + N * Cout * HW) * itemsize,
    )

    out = pl.pallas_call(
        _head_matmul_kernel,
        out_shape=jax.ShapeDtypeStruct((N, Cout, HW), x_nchw.dtype),
        grid_spec=pltpu.PrefetchScalarGridSpec(
            num_scalar_prefetch=0,
            grid=grid,
            in_specs=[
                # Batch dim squeezed out of the kernel view.
                pl.BlockSpec((None, C, t_hw), lambda n, j: (n, 0, j)),
                pl.BlockSpec((Cout, C), lambda n, j: (0, 0)),
                pl.BlockSpec((Cout, 1), lambda n, j: (0, 0)),
            ],
            out_specs=pl.BlockSpec((None, Cout, t_hw), lambda n, j: (n, 0, j)),
        ),
        compiler_params=pltpu.CompilerParams(
            dimension_semantics=("parallel", "parallel")),
        cost_estimate=cost,
    )(x3, w_t, b2d)

    # Cheap NHWC permute on the narrow (<=20-channel) outputs only.
    out = out.reshape(N, Cout, H, W)
    n_box, n_cls, n_dir = splits
    box_preds = jnp.transpose(out[:, :n_box], (0, 2, 3, 1))
    cls_preds = jnp.transpose(out[:, n_box:n_box + n_cls], (0, 2, 3, 1))
    dir_cls_preds = jnp.transpose(
        out[:, n_box + n_cls:n_box + n_cls + n_dir], (0, 2, 3, 1))
    return box_preds, cls_preds, dir_cls_preds


def _reference(x_nchw, w_box, w_cls, w_dir, b_box, b_cls, b_dir):
    x_nhwc = jnp.transpose(x_nchw, (0, 2, 3, 1))
    ref_box = jnp.einsum("nhwc,co->nhwo", x_nhwc, w_box) + b_box
    ref_cls = jnp.einsum("nhwc,co->nhwo", x_nhwc, w_cls) + b_cls
    ref_dir = jnp.einsum("nhwc,co->nhwo", x_nhwc, w_dir) + b_dir
    return ref_box, ref_cls, ref_dir


if __name__ == "__main__":
    # Module hyperparameters (small but consistent with SSDRotateHead.__init__)
    num_class = 1
    num_anchor_per_loc = 2
    box_code_size = 7
    num_output_filters = 128          # conv in-channels C

    num_cls = num_anchor_per_loc * num_class            # 2   (sigmoid cls)
    num_box = num_anchor_per_loc * box_code_size        # 14
    num_dir = num_anchor_per_loc * 2                    # 4

    N, C, H, W = 2, num_output_filters, 16, 16

    key = jax.random.PRNGKey(0)
    k_x, k_wb, k_wc, k_wd, k_bb, k_bc, k_bd, k_x2 = jax.random.split(key, 8)

    x = jax.random.normal(k_x, (N, C, H, W), dtype=jnp.float32)

    # A 1x1 Conv2d weight (Cout, Cin, 1, 1) is a (Cin, Cout) matmul weight.
    w_box = jax.random.normal(k_wb, (C, num_box), dtype=jnp.float32) * 0.02
    w_cls = jax.random.normal(k_wc, (C, num_cls), dtype=jnp.float32) * 0.02
    w_dir = jax.random.normal(k_wd, (C, num_dir), dtype=jnp.float32) * 0.02
    b_box = jax.random.normal(k_bb, (num_box,), dtype=jnp.float32) * 0.01
    b_cls = jax.random.normal(k_bc, (num_cls,), dtype=jnp.float32) * 0.01
    b_dir = jax.random.normal(k_bd, (num_dir,), dtype=jnp.float32) * 0.01

    # Concatenate heads along output channels: [box | cls | dir]
    w_cat = jnp.concatenate([w_box, w_cls, w_dir], axis=1)
    b_cat = jnp.concatenate([b_box, b_cls, b_dir], axis=0)
    splits = (num_box, num_cls, num_dir)

    # --- main run -----------------------------------------------------------
    box_preds, cls_preds, dir_cls_preds = ssd_rotate_head_forward(
        x, w_cat, b_cat, splits)
    jax.block_until_ready((box_preds, cls_preds, dir_cls_preds))

    ref_box, ref_cls, ref_dir = _reference(
        x, w_box, w_cls, w_dir, b_box, b_cls, b_dir)
    assert box_preds.shape == (N, H, W, num_box)
    assert cls_preds.shape == (N, H, W, num_cls)
    assert dir_cls_preds.shape == (N, H, W, num_dir)
    assert jnp.allclose(box_preds, ref_box, atol=1e-3)
    assert jnp.allclose(cls_preds, ref_cls, atol=1e-3)
    assert jnp.allclose(dir_cls_preds, ref_dir, atol=1e-3)

    # --- ragged spatial size (H*W not a multiple of the tile) ---------------
    Hr, Wr = 12, 12                           # HW = 144 -> partial last block
    xr = jax.random.normal(k_x2, (N, C, Hr, Wr), dtype=jnp.float32)
    rb, rc, rd = ssd_rotate_head_forward(xr, w_cat, b_cat, splits, t_hw=128)
    jax.block_until_ready((rb, rc, rd))
    ref_rb, ref_rc, ref_rd = _reference(
        xr, w_box, w_cls, w_dir, b_box, b_cls, b_dir)
    assert jnp.allclose(rb, ref_rb, atol=1e-3)
    assert jnp.allclose(rc, ref_rc, atol=1e-3)
    assert jnp.allclose(rd, ref_rd, atol=1e-3)

    # TODO(synk): the alignment-head branch (get_guided_anchors + rotated NMS)
    # is data-dependent ragged gather/filter with no clean Pallas equivalent
    # and is disabled in the default config (alignment_head_cfg=None); only the
    # (rpn_outs, None) path is implemented.
    print("KERNEL_OK")
</pallas_src>

<mosaic_0001>
module attributes {stable_mosaic.version = 11 : i64} {
  func.func @_head_matmul_kernel(%arg0: i32, %arg1: i32, %arg2: memref<1x128x256xf32, #tpu.memory_space<vmem>>, %arg3: memref<20x128xf32, #tpu.memory_space<vmem>>, %arg4: memref<20x1xf32, #tpu.memory_space<vmem>>, %arg5: memref<1x20x256xf32, #tpu.memory_space<vmem>>) attributes {dimension_semantics = [#tpu.dimension_semantics<parallel>, #tpu.dimension_semantics<parallel>], iteration_bounds = array<i64: 2, 1>, scalar_prefetch = 0 : i64, scratch_operands = 0 : i64, tpu.core_type = #tpu.core_type<tc>, window_params = [{transform_indices = @transform_0, window_bounds = array<i64: 1, 128, 256>}, {pipeline_mode = #tpu.pipeline_mode<synchronous>, transform_indices = @transform_1, window_bounds = array<i64: 20, 128>}, {pipeline_mode = #tpu.pipeline_mode<synchronous>, transform_indices = @transform_2, window_bounds = array<i64: 20, 1>}, {transform_indices = @transform_3, window_bounds = array<i64: 1, 20, 256>}]} {
    %c0 = arith.constant 0 : index
    %c0_0 = arith.constant 0 : index
    %0 = vector.load %arg3[%c0, %c0_0] : memref<20x128xf32, #tpu.memory_space<vmem>>, vector<20x128xf32>
    %c0_1 = arith.constant 0 : index
    %c0_2 = arith.constant 0 : index
    %c0_3 = arith.constant 0 : index
    %1 = vector.load %arg2[%c0_1, %c0_2, %c0_3] : memref<1x128x256xf32, #tpu.memory_space<vmem>>, vector<1x128x256xf32>
    %2 = vector.shape_cast %1 : vector<1x128x256xf32> to vector<128x256xf32>
    %cst = arith.constant dense<0.000000e+00> : vector<20x256xf32>
    %3 = tpu.matmul %0, %2, %cst {dimension_numbers = #tpu.dot_dimension_numbers<[1], [0], [0], [1], [0, 0, 1, 1], [], []>} : vector<20x128xf32>, vector<128x256xf32>, vector<20x256xf32> -> vector<20x256xf32>
    %c0_4 = arith.constant 0 : index
    %c0_5 = arith.constant 0 : index
    %4 = vector.load %arg4[%c0_4, %c0_5] : memref<20x1xf32, #tpu.memory_space<vmem>>, vector<20x1xf32>
    %5 = vector.broadcast %4 : vector<20x1xf32> to vector<20x256xf32>
    %6 = arith.addf %3, %5 : vector<20x256xf32>
    %c0_6 = arith.constant 0 : index
    %c0_7 = arith.constant 0 : index
    %c0_8 = arith.constant 0 : index
    %7 = vector.load %arg5[%c0_6, %c0_7, %c0_8] : memref<1x20x256xf32, #tpu.memory_space<vmem>>, vector<1x20x256xf32>
    %8 = vector.shape_cast %7 : vector<1x20x256xf32> to vector<20x256xf32>
    %9 = vector.shape_cast %6 : vector<20x256xf32> to vector<1x20x256xf32>
    tpu.vector_store %arg5[%c0_6, %c0_7, %c0_8], %9 {strides = array<i32>} : memref<1x20x256xf32, #tpu.memory_space<vmem>>, vector<1x20x256xf32>,
    return
  }
  func.func @transform_0(%arg0: i32, %arg1: i32) -> (i32, i32, i32) {
    %c0_i32 = arith.constant 0 : i32
    %c0_i32_0 = arith.constant 0 : i32
    return %arg0, %c0_i32, %arg1 : i32, i32, i32
  }
  func.func @transform_1(%arg0: i32, %arg1: i32) -> (i32, i32) {
    %c0_i32 = arith.constant 0 : i32
    %c0_i32_0 = arith.constant 0 : i32
    %c0_i32_1 = arith.constant 0 : i32
    return %c0_i32, %c0_i32_0 : i32, i32
  }
  func.func @transform_2(%arg0: i32, %arg1: i32) -> (i32, i32) {
    %c0_i32 = arith.constant 0 : i32
    %c0_i32_0 = arith.constant 0 : i32
    %c0_i32_1 = arith.constant 0 : i32
    return %c0_i32, %c0_i32_0 : i32, i32
  }
  func.func @transform_3(%arg0: i32, %arg1: i32) -> (i32, i32, i32) {
    %c0_i32 = arith.constant 0 : i32
    %c0_i32_0 = arith.constant 0 : i32
    return %arg0, %c0_i32, %arg1 : i32, i32, i32
  }
}

</mosaic_0001>

<bundles_post_ra>
// kernel: ssd_rotate_head_forward.1
= control target key start
LH: loop header
LB: loop body
LE: loop exit
PB: predicated region body
PF: predicated region fallthrough
CT: control target
= control target key end

     0   :  { %s573_s12 = smov 0   ;;  %s575_s13 = smov 0   ;;  %s665_s0 = inlined_call_operand.vmem [shape: f32[2,128,256], index: 0, kind: input, shape index: {}]   ;;  %s666_s1 = inlined_call_operand.vmem [shape: f32[20,128], index: 1, kind: input, shape index: {}]   ;;  %s667_s2 = inlined_call_operand.vmem [shape: f32[20,1], index: 2, kind: input, shape index: {}]   ;;  %s668_s3 = inlined_call_operand.vmem [shape: f32[2,20,256], index: 3, kind: output, shape index: {}]  }
   0x1   :  { %s577_s14 = smov 0  }
   0x2 LB: > { %s25_s15 = sadd.s32 1, %s545_s13  ;;  %p443_p0 = scmp.ge.s32.totalorder %s549_s14, 1  ;;  %s549_s14 = sphi %s577_s14, %s13_s14   ;;  %s545_s13 = sphi %s575_s13, %s670_s13   ;;  %s541_s12 = sphi %s573_s12, %s669_s12  }
   0x3   : > { %p27_p1 = scmp.ge.s32.totalorder %s25_s15, 2  ;;  %p158_p2 = scmp.lt.s32.totalorder %s549_s14, 3 }
   0x5   : > { %s672_s15 = smov (%p27_p1, %s25_s15), 0  ;;  %p159_p3 = pnand %p443_p0, %p158_p2 }
   0x6   : > { %p191_p4 = scmp.lt.s32.totalorder (!%p159_p3), %s541_s12, 1  ;;  %v551_v0 = vmov (!%p159_p3), 0.0   ;;  %v245_v1 = vld [vmem:[%s667_s2] sm:$0xff] (!%p159_p3)  ;;  %v247_v2 = vld [vmem:[%s667_s2 + $0x10] sm:$0xf] (!%p159_p3)  ;;  %v552_v3 = vmov (!%p159_p3), 0  }
   0x7   : > { %162 = sbr.rel (%p159_p3) target bundleno = 272 (0x110), region = 32  ;;  %327 = vmatprep.mubr.f32.mxu0 (!%p159_p3), %v551_v0  ;;  %333 = vmatprep.mubr.f32.mxu1 (!%p159_p3), %v551_v0  ;;  %v246_v4 = vld [vmem:[%s667_s2 + $0x8] sm:$0xff] (!%p159_p3)  ;;  %v210_v53 = vld [vmem:[%s666_s1] sm:$0xff] (!%p159_p3)  ;;  %v212_v55 = vld [vmem:[%s666_s1 + $0x10] sm:$0xf] (!%p159_p3) }
   0x8   : > { %525 = vset.pattern.permute.xlu0 (!%p159_p3), %v552_v3  ;;  %526 = vset.pattern.permute.xlu1 (!%p159_p3), %v552_v3  ;;  %v211_v54 = vld [vmem:[%s666_s1 + $0x8] sm:$0xff] (!%p159_p3) }
   0x9   : > { %250 = vperm.xlu0 (!%p159_p3), %525, %v245_v1   ;;  %260 = vperm.xlu1 (!%p159_p3), %526, %v247_v2  }
   0xd   : > { %255 = vperm.xlu0 (!%p159_p3), %525, %v246_v4  }
   0xe   : > { %s674_s12 = smov (!%p191_p4, %s541_s12), 1 }
   0xf   : > { %s449_s20 = sshll.u32 %s674_s12, 8  ;;  %s498_s5 = smul.u32 48, %s674_s12 }
  0x10   : > { %s608_s25 = scalar_lea.vmem %s665_s0, %s449_s20 }
  0x11   : > { %v214_v5 = vld [vmem:[%s608_s25 + $0x8] sm:$0xff]  ;;  %v216_v6 = vld [vmem:[%s608_s25 + $0x18] sm:$0xff]  ;;  %v213_v7 = vld [vmem:[%s608_s25] sm:$0xff]  ;;  %s208_s8 = scalar_lea.vmem %s668_s3, %s498_s5 }
  0x12   : > { %v450_v8 = vpack.c.bf16 %v216_v6, %v214_v5  ;;  %v215_v9 = vld [vmem:[%s608_s25 + $0x10] sm:$0xff]  ;;  %v218_v10 = vld [vmem:[%s608_s25 + $0x28] sm:$0xff]  ;;  %v220_v11 = vld [vmem:[%s608_s25 + $0x38] sm:$0xff] }
  0x13   : > { %v452_v12 = vpack.c.bf16 %v215_v9, %v213_v7  ;;  %v454_v13 = vpack.c.bf16 %v220_v11, %v218_v10  ;;  %v217_v14 = vld [vmem:[%s608_s25 + $0x20] sm:$0xff]  ;;  %v219_v15 = vld [vmem:[%s608_s25 + $0x30] sm:$0xff]  ;;  %v222_v16 = vld [vmem:[%s608_s25 + $0x48] sm:$0xff] }
  0x14   : > { %451 = vmatprep.subr.bf16.mxu0 %v450_v8  ;;  %482 = vmatprep.subr.bf16.mxu1 %v450_v8  ;;  %v224_v17 = vld [vmem:[%s608_s25 + $0x58] sm:$0xff]  ;;  %v456_v18 = vpack.c.bf16 %v219_v15, %v217_v14  ;;  %v221_v20 = vld [vmem:[%s608_s25 + $0x40] sm:$0xff]  ;;  %v223_v21 = vld [vmem:[%s608_s25 + $0x50] sm:$0xff] }
  0x15   : > { %453 = vmatpush1.bf16.msra.mxu0 %v452_v12  ;;  %490 = vmatpush1.bf16.msra.mxu1 %v452_v12  ;;  %v458_v19 = vpack.c.bf16 %v224_v17, %v222_v16  ;;  %v226_v22 = vld [vmem:[%s608_s25 + $0x68] sm:$0xff]  ;;  %v228_v23 = vld [vmem:[%s608_s25 + $0x78] sm:$0xff]  ;;  %v460_v24 = vpack.c.bf16 %v223_v21, %v221_v20  ;;  %v225_v26 = vld [vmem:[%s608_s25 + $0x60] sm:$0xff] }
  0x16   : > { %455 = vmatprep.subr.bf16.mxu0 %v454_v13  ;;  %483 = vmatprep.subr.bf16.mxu1 %v454_v13  ;;  %v462_v25 = vpack.c.bf16 %v228_v23, %v226_v22  ;;  %v227_v27 = vld [vmem:[%s608_s25 + $0x70] sm:$0xff]  ;;  %v230_v28 = vld [vmem:[%s608_s25 + $0x88] sm:$0xff]  ;;  %v232_v29 = vld [vmem:[%s608_s25 + $0x98] sm:$0xff] }
  0x17   : > { %v464_v30 = vpack.c.bf16 %v227_v27, %v225_v26  ;;  %v466_v31 = vpack.c.bf16 %v232_v29, %v230_v28  ;;  %v229_v32 = vld [vmem:[%s608_s25 + $0x80] sm:$0xff]  ;;  %v231_v33 = vld [vmem:[%s608_s25 + $0x90] sm:$0xff]  ;;  %v234_v34 = vld [vmem:[%s608_s25 + $0xa8] sm:$0xff] }
  0x18   : > { %v236_v35 = vld [vmem:[%s608_s25 + $0xb8] sm:$0xff]  ;;  %v468_v36 = vpack.c.bf16 %v231_v33, %v229_v32  ;;  %v233_v38 = vld [vmem:[%s608_s25 + $0xa0] sm:$0xff]  ;;  %v235_v39 = vld [vmem:[%s608_s25 + $0xb0] sm:$0xff] }
  0x19   : > { %457 = vmatpush1.bf16.msra.mxu0 %v456_v18  ;;  %491 = vmatpush1.bf16.msra.mxu1 %v456_v18  ;;  %v470_v37 = vpack.c.bf16 %v236_v35, %v234_v34  ;;  %v238_v40 = vld [vmem:[%s608_s25 + $0xc8] sm:$0xff]  ;;  %v240_v41 = vld [vmem:[%s608_s25 + $0xd8] sm:$0xff]  ;;  %v472_v42 = vpack.c.bf16 %v235_v39, %v233_v38  ;;  %v237_v44 = vld [vmem:[%s608_s25 + $0xc0] sm:$0xff] }
  0x1a   : > { %459 = vmatprep.subr.bf16.mxu0 %v458_v19  ;;  %484 = vmatprep.subr.bf16.mxu1 %v458_v19  ;;  %v474_v43 = vpack.c.bf16 %v240_v41, %v238_v40  ;;  %v239_v45 = vld [vmem:[%s608_s25 + $0xd0] sm:$0xff]  ;;  %v242_v46 = vld [vmem:[%s608_s25 + $0xe8] sm:$0xff]  ;;  %v244_v47 = vld [vmem:[%s608_s25 + $0xf8] sm:$0xff] }
  0x1b   : > { %v476_v48 = vpack.c.bf16 %v239_v45, %v237_v44  ;;  %v478_v49 = vpack.c.bf16 %v244_v47, %v242_v46  ;;  %v241_v50 = vld [vmem:[%s608_s25 + $0xe0] sm:$0xff]  ;;  %v243_v51 = vld [vmem:[%s608_s25 + $0xf0] sm:$0xff] }
  0x1c   : > { %v480_v52 = vpack.c.bf16 %v243_v51, %v241_v50 }
  0x1d   : > { %461 = vmatpush1.bf16.msra.mxu0 %v460_v24  ;;  %492 = vmatpush1.bf16.msra.mxu1 %v460_v24 }
  0x1e   : > { %463 = vmatprep.subr.bf16.mxu0 %v462_v25  ;;  %485 = vmatprep.subr.bf16.mxu1 %v462_v25 }
  0x21   : > { %465 = vmatpush1.bf16.msra.mxu0 %v464_v30  ;;  %493 = vmatpush1.bf16.msra.mxu1 %v464_v30 }
  0x22   : > { %467 = vmatprep.subr.bf16.mxu0 %v466_v31  ;;  %486 = vmatprep.subr.bf16.mxu1 %v466_v31 }
  0x25   : > { %469 = vmatpush1.bf16.msra.mxu0 %v468_v36  ;;  %494 = vmatpush1.bf16.msra.mxu1 %v468_v36 }
  0x26   : > { %471 = vmatprep.subr.bf16.mxu0 %v470_v37  ;;  %487 = vmatprep.subr.bf16.mxu1 %v470_v37 }
  0x29   : > { %473 = vmatpush1.bf16.msra.mxu0 %v472_v42  ;;  %495 = vmatpush1.bf16.msra.mxu1 %v472_v42 }
  0x2a   : > { %475 = vmatprep.subr.bf16.mxu0 %v474_v43  ;;  %488 = vmatprep.subr.bf16.mxu1 %v474_v43 }
  0x2d   : > { %477 = vmatpush1.bf16.msra.mxu0 %v476_v48  ;;  %496 = vmatpush1.bf16.msra.mxu1 %v476_v48 }
  0x2e   : > { %479 = vmatprep.subr.bf16.mxu0 %v478_v49  ;;  %489 = vmatprep.subr.bf16.mxu1 %v478_v49 }
  0x31   : > { %481 = vmatpush1.bf16.msra.mxu0 %v480_v52  ;;  %497 = vmatpush1.bf16.msra.mxu1 %v480_v52 }
  0x34   : > { %328 = vmatmul.mubr.f32.vlgmr.msra.gmra.mrb[0].mxu0 %v210_v53  ;;  %334 = vmatmul.mubr.f32.vlgmr.msra.gmra.mrb[0].mxu1 %v211_v54 }
  0x35   : > { %339 = vmatprep.mubr.f32.mxu1 %v551_v0 }
  0x38   : > { %340 = vmatmul.mubr.f32.gmra.mrb[2].mxu1 %v212_v55 }
  0x88   : > { %v251_v56 = vpop.permute.xlu0 %250  ;;  %v261_v2 = vpop.permute.xlu1 %260 }
  0x8c   : > { %v256_v57 = vpop.permute.xlu0 %255 }
 0x107   : > { %v329_v58 = vpop.f32.mrb[0].mxu0  ;;  %v335_v59 = vpop.f32.mrb[0].mxu1 }
 0x108   : > { %v330_v60 = vadd.f32 %v329_v58, %v251_v56  ;;  %v336_v61 = vadd.f32 %v335_v59, %v256_v57  ;;  %v331_v62 = vpop.f32.mrb[1].mxu0  ;;  %v337_v63 = vpop.f32.mrb[1].mxu1 }
 0x109   : > { %v332_v1 = vadd.f32 %v331_v62, %v251_v56  ;;  %v338_v0 = vadd.f32 %v337_v63, %v256_v57 }
 0x10a   : > { %346 = vst [vmem:[%s208_s8] sm:$0xff] %v330_v60  ;;  %348 = vst [vmem:[%s208_s8 + $0x10] sm:$0xff] %v336_v61 }
 0x10b   : > { %347 = vst [vmem:[%s208_s8 + $0x8] sm:$0xff] %v332_v1  ;;  %349 = vst [vmem:[%s208_s8 + $0x18] sm:$0xff] %v338_v0  ;;  %v341_v3 = vpop.f32.mrb[2].mxu1 }
 0x10c   : > { %v342_v4 = vadd.f32 %v341_v3, %v261_v2  ;;  %v343_v5 = vpop.f32.mrb[3].mxu1 }
 0x10d   : > { %v344_v6 = vadd.f32 %v343_v5, %v261_v2 }
 0x10e   : > { %350 = vst [vmem:[%s208_s8 + $0x20] sm:$0xf] %v342_v4 }
 0x10f   : > { %351 = vst [vmem:[%s208_s8 + $0x28] sm:$0xf] %v344_v6 }
 0x110 PF: > { %s13_s14 = sadd.s32 1, %s549_s14   ;;  %s669_s12 = smov %s545_s13 }
 0x111   : > { %p10_p5 = scmp.ge.s32.totalorder %s13_s14, 4   ;;  %s670_s13 = smov %s672_s15 }
 0x113   :  { %12 = sbr.rel (!%p10_p5) target bundleno = 2 (0x2), region = 62 }

</bundles_post_ra>
